<compile_context>
chip_gen: v6e
topology: v6e:2x2x1
jax: 0.10.0
libtpu: 0.0.40
codegen_flags: <defaults>
</compile_context>

<pallas_src>
import jax
import jax.numpy as jnp
from jax.experimental import pallas as pl
from jax.experimental.pallas import tpu as pltpu


def _mlp_kernel(x_ref, w1_ref, b1_ref, w2_ref, b2_ref, o_ref):
    # x_ref : (TB, D_in)   bf16 VMEM (batch tile)
    # w1_ref: (D_in, H)    bf16 VMEM (resident across grid steps)
    # b1_ref: (1, H)       f32  VMEM
    # w2_ref: (H, D_out)   bf16 VMEM (resident across grid steps)
    # b2_ref: (1, D_out)   f32  VMEM
    # o_ref : (TB, D_out)  VMEM (output dtype of the caller, lane-dense)
    x = x_ref[...]                                                  # bf16
    h = jnp.dot(x, w1_ref[...], preferred_element_type=jnp.float32)  # MXU, f32 acc
    h = jnp.maximum(h + b1_ref[...], 0.0)                           # bias + ReLU on VPU (f32)
    h = h.astype(jnp.bfloat16)                                       # explicit bf16 for 2nd MXU pass
    y = jnp.dot(h, w2_ref[...], preferred_element_type=jnp.float32)  # MXU, f32 acc
    y = y + b2_ref[...]
    o_ref[...] = y.astype(o_ref.dtype)


def one_to_many_network_forward(x, params, k=None, *, block_b=128):
    """Equivalent of OneToManyNetwork(network).forward(x, k) — `k` is ignored."""
    del k
    w1, b1, w2, b2 = params          # w1/w2: bf16 (in, out); b1/b2: f32 (1, N)
    B, D_in = x.shape
    H = w1.shape[1]
    D_out = w2.shape[1]
    out_dtype = x.dtype

    # Cast activations to bf16 once in the wrapper (MXU fast path on v5e/v6e/v7x).
    xb = x.astype(jnp.bfloat16)

    # Batch tile: multiple of 8 (sublane rule), capped at block_b.
    tb = min(block_b, B)
    tb = max(8, ((tb + 7) // 8) * 8)
    n_blocks = pl.cdiv(B, tb)
    padded_b = n_blocks * tb
    if padded_b != B:
        xb = jnp.pad(xb, ((0, padded_b - B), (0, 0)))

    flops = 2 * padded_b * (D_in * H + H * D_out)
    bytes_accessed = (
        padded_b * D_in * 2                       # x (bf16)
        + (D_in * H + H * D_out) * 2              # weights (bf16, fetched once)
        + (H + D_out) * 4                         # biases (f32)
        + padded_b * D_out * jnp.dtype(out_dtype).itemsize  # output
    )

    out = pl.pallas_call(
        _mlp_kernel,
        out_shape=jax.ShapeDtypeStruct((padded_b, D_out), out_dtype),
        grid_spec=pltpu.PrefetchScalarGridSpec(
            num_scalar_prefetch=0,
            grid=(n_blocks,),
            in_specs=[
                pl.BlockSpec((tb, D_in), lambda i: (i, 0)),     # x: one batch tile per step
                pl.BlockSpec((D_in, H), lambda i: (0, 0)),      # w1: VMEM-resident
                pl.BlockSpec((1, H), lambda i: (0, 0)),         # b1
                pl.BlockSpec((H, D_out), lambda i: (0, 0)),     # w2: VMEM-resident
                pl.BlockSpec((1, D_out), lambda i: (0, 0)),     # b2
            ],
            out_specs=pl.BlockSpec((tb, D_out), lambda i: (i, 0)),
        ),
        compiler_params=pltpu.CompilerParams(
            dimension_semantics=("parallel",),                  # shard batch across v7x TCs
        ),
        cost_estimate=pl.CostEstimate(
            flops=flops, transcendentals=0, bytes_accessed=bytes_accessed
        ),
    )(xb, w1, b1, w2, b2)

    return out[:B] if padded_b != B else out


def init_params(key, d_in, hidden, d_out):
    """Parameter init mirroring nn.Linear's shapes.

    PyTorch nn.Linear(in, out) stores weight as (out, in) and bias as (out,).
    We generate those shapes, transpose weights to (in, out), store them in bf16
    (kernel matmul operands), and keep biases in f32 shaped (1, N) for lane-broadcast.
    """
    k1, k2, k3, k4 = jax.random.split(key, 4)
    w1_t = jax.random.normal(k1, (hidden, d_in), jnp.float32) * 0.02   # (out, in) like torch
    b1 = jax.random.normal(k2, (hidden,), jnp.float32) * 0.02
    w2_t = jax.random.normal(k3, (d_out, hidden), jnp.float32) * 0.02
    b2 = jax.random.normal(k4, (d_out,), jnp.float32) * 0.02
    return (
        w1_t.T.astype(jnp.bfloat16),
        b1.reshape(1, hidden),
        w2_t.T.astype(jnp.bfloat16),
        b2.reshape(1, d_out),
    )


def reference_forward(x, params):
    """Pure-JAX f32 reference (weights upcast from their stored bf16)."""
    w1, b1, w2, b2 = params
    h = jnp.maximum(x @ w1.astype(jnp.float32) + b1, 0.0)
    return h @ w2.astype(jnp.float32) + b2


if __name__ == "__main__":
    # Small shapes consistent with the module; B=200 exercises both batch tiling
    # (two 128-row grid steps after padding to 256) and the pad/slice path.
    B, D_IN, HIDDEN, D_OUT = 200, 128, 256, 128

    key = jax.random.PRNGKey(0)
    kx, kp = jax.random.split(key)
    x = jax.random.normal(kx, (B, D_IN), jnp.float32)
    params = init_params(kp, D_IN, HIDDEN, D_OUT)

    out = one_to_many_network_forward(x, params, k=3)  # k is ignored, as in the module
    out = jax.block_until_ready(out)

    ref = reference_forward(x, params)
    assert out.shape == (B, D_OUT)
    # bf16 MXU operands with f32 accumulation vs. full-f32 reference.
    assert jnp.allclose(out, ref, atol=2e-2, rtol=2e-2), "mismatch vs. JAX reference"

    print("KERNEL_OK")
</pallas_src>

<mosaic_0001>
module attributes {stable_mosaic.version = 11 : i64} {
  func.func @_mlp_kernel(%arg0: i32, %arg1: memref<128x128xbf16, #tpu.memory_space<vmem>>, %arg2: memref<128x256xbf16, #tpu.memory_space<vmem>>, %arg3: memref<1x256xf32, #tpu.memory_space<vmem>>, %arg4: memref<256x128xbf16, #tpu.memory_space<vmem>>, %arg5: memref<1x128xf32, #tpu.memory_space<vmem>>, %arg6: memref<128x128xf32, #tpu.memory_space<vmem>>) attributes {dimension_semantics = [#tpu.dimension_semantics<parallel>], iteration_bounds = array<i64: 2>, scalar_prefetch = 0 : i64, scratch_operands = 0 : i64, tpu.core_type = #tpu.core_type<tc>, window_params = [{transform_indices = @transform_0, window_bounds = array<i64: 128, 128>}, {pipeline_mode = #tpu.pipeline_mode<synchronous>, transform_indices = @transform_1, window_bounds = array<i64: 128, 256>}, {pipeline_mode = #tpu.pipeline_mode<synchronous>, transform_indices = @transform_2, window_bounds = array<i64: 1, 256>}, {pipeline_mode = #tpu.pipeline_mode<synchronous>, transform_indices = @transform_3, window_bounds = array<i64: 256, 128>}, {pipeline_mode = #tpu.pipeline_mode<synchronous>, transform_indices = @transform_4, window_bounds = array<i64: 1, 128>}, {transform_indices = @transform_5, window_bounds = array<i64: 128, 128>}]} {
    %c0 = arith.constant 0 : index
    %c0_0 = arith.constant 0 : index
    %0 = vector.load %arg1[%c0, %c0_0] : memref<128x128xbf16, #tpu.memory_space<vmem>>, vector<128x128xbf16>
    %c0_1 = arith.constant 0 : index
    %c0_2 = arith.constant 0 : index
    %1 = vector.load %arg2[%c0_1, %c0_2] : memref<128x256xbf16, #tpu.memory_space<vmem>>, vector<128x256xbf16>
    %cst = arith.constant dense<0.000000e+00> : vector<128x256xf32>
    %2 = tpu.matmul %0, %1, %cst {dimension_numbers = #tpu.dot_dimension_numbers<[1], [0], [0], [1], [0, 0, 1, 1], [], []>} : vector<128x128xbf16>, vector<128x256xbf16>, vector<128x256xf32> -> vector<128x256xf32>
    %c0_3 = arith.constant 0 : index
    %c0_4 = arith.constant 0 : index
    %3 = vector.load %arg3[%c0_3, %c0_4] : memref<1x256xf32, #tpu.memory_space<vmem>>, vector<1x256xf32>
    %4 = vector.broadcast %3 : vector<1x256xf32> to vector<128x256xf32>
    %5 = arith.addf %2, %4 : vector<128x256xf32>
    %cst_5 = arith.constant 0.000000e+00 : f32
    %6 = vector.broadcast %cst_5 : f32 to vector<128x256xf32>
    %7 = arith.maximumf %5, %6 : vector<128x256xf32>
    %8 = arith.truncf %7 : vector<128x256xf32> to vector<128x256xbf16>
    %c0_6 = arith.constant 0 : index
    %c0_7 = arith.constant 0 : index
    %9 = vector.load %arg4[%c0_6, %c0_7] : memref<256x128xbf16, #tpu.memory_space<vmem>>, vector<256x128xbf16>
    %cst_8 = arith.constant dense<0.000000e+00> : vector<128x128xf32>
    %10 = tpu.matmul %8, %9, %cst_8 {dimension_numbers = #tpu.dot_dimension_numbers<[1], [0], [0], [1], [0, 0, 1, 1], [], []>} : vector<128x256xbf16>, vector<256x128xbf16>, vector<128x128xf32> -> vector<128x128xf32>
    %c0_9 = arith.constant 0 : index
    %c0_10 = arith.constant 0 : index
    %11 = vector.load %arg5[%c0_9, %c0_10] : memref<1x128xf32, #tpu.memory_space<vmem>>, vector<1x128xf32>
    %12 = vector.broadcast %11 : vector<1x128xf32> to vector<128x128xf32>
    %13 = arith.addf %10, %12 : vector<128x128xf32>
    %c0_11 = arith.constant 0 : index
    %c0_12 = arith.constant 0 : index
    %14 = vector.load %arg6[%c0_11, %c0_12] : memref<128x128xf32, #tpu.memory_space<vmem>>, vector<128x128xf32>
    tpu.vector_store %arg6[%c0_11, %c0_12], %13 {strides = array<i32>} : memref<128x128xf32, #tpu.memory_space<vmem>>, vector<128x128xf32>,
    return
  }
  func.func @transform_0(%arg0: i32) -> (i32, i32) {
    %c0_i32 = arith.constant 0 : i32
    %c0_i32_0 = arith.constant 0 : i32
    return %arg0, %c0_i32 : i32, i32
  }
  func.func @transform_1(%arg0: i32) -> (i32, i32) {
    %c0_i32 = arith.constant 0 : i32
    %c0_i32_0 = arith.constant 0 : i32
    %c0_i32_1 = arith.constant 0 : i32
    return %c0_i32, %c0_i32_0 : i32, i32
  }
  func.func @transform_2(%arg0: i32) -> (i32, i32) {
    %c0_i32 = arith.constant 0 : i32
    %c0_i32_0 = arith.constant 0 : i32
    %c0_i32_1 = arith.constant 0 : i32
    return %c0_i32, %c0_i32_0 : i32, i32
  }
  func.func @transform_3(%arg0: i32) -> (i32, i32) {
    %c0_i32 = arith.constant 0 : i32
    %c0_i32_0 = arith.constant 0 : i32
    %c0_i32_1 = arith.constant 0 : i32
    return %c0_i32, %c0_i32_0 : i32, i32
  }
  func.func @transform_4(%arg0: i32) -> (i32, i32) {
    %c0_i32 = arith.constant 0 : i32
    %c0_i32_0 = arith.constant 0 : i32
    %c0_i32_1 = arith.constant 0 : i32
    return %c0_i32, %c0_i32_0 : i32, i32
  }
  func.func @transform_5(%arg0: i32) -> (i32, i32) {
    %c0_i32 = arith.constant 0 : i32
    %c0_i32_0 = arith.constant 0 : i32
    return %arg0, %c0_i32 : i32, i32
  }
}

</mosaic_0001>

<bundles_post_ra>
// kernel: tpu_custom_call.1
= control target key start
LH: loop header
LB: loop body
LE: loop exit
PB: predicated region body
PF: predicated region fallthrough
CT: control target
= control target key end

     0   :  { %10 = vsyncpa [#allocation3], 0  ;;  %s1692_s0 = inlined_call_operand.hbm [shape: bf16[256,128], index: 0, kind: input, shape index: {}]   ;;  %s1693_s1 = inlined_call_operand.hbm [shape: bf16[128,256], index: 1, kind: input, shape index: {}]   ;;  %s1694_s2 = inlined_call_operand.vmem [shape: f32[1,256], index: 2, kind: input, shape index: {}]   ;;  %s1695_s3 = inlined_call_operand.hbm [shape: bf16[256,128], index: 3, kind: input, shape index: {}]   ;;  %s1696_s4 = inlined_call_operand.vmem [shape: f32[1,128], index: 4, kind: input, shape index: {}]   ;;  %s1697_s5 = inlined_call_operand.hbm [shape: f32[256,128], index: 5, kind: output, shape index: {}]  }
   0x1   :  { %12 = vsyncpa [#allocation3 + $0x1], 0 }
   0x2   :  { %13 = vsyncpa [#allocation6], 0 }
   0x3   :  { %14 = vsyncpa [#allocation4], 0 }
   0x4   :  { %16 = vsyncpa [#allocation4 + $0x1], 0  ;;  %s1400_s18 = smov 0   ;;  %s1402_s19 = smov 0  }
   0x5   :  { %s1404_s20 = smov 0   ;;  %s1406_s21 = smov 0  }
   0x6 LB: > { %s1421_s22 = sadd.s32 4294967295, %s1357_s21   ;;  %s962_s23 = sadd.s32 4294967294, %s1357_s21   ;;  %s1357_s21 = sphi %s1406_s21, %s1721_s21   ;;  %s1353_s20 = sphi %s1404_s20, %s1720_s20   ;;  %s1349_s19 = sphi %s1402_s19, %s1719_s19   ;;  %s1345_s18 = sphi %s1400_s18, %s1718_s18  }
   0x7   : > { %p42_p0 = scmp.ne.s32.totalorder %s1349_s19, %s1345_s18  ;;  %p1698_p1 = scmp.eq.s32.totalorder %s1421_s22, 0 }
   0x8   : > { %p156_p3 = scmp.eq.s32.totalorder %s962_s23, 1  ;;  %p963_p5 = scmp.ge.s32.totalorder %s1357_s21, 1 }
   0x9   : > { %p1430_p4 = por %p1698_p1, %p42_p0  ;;  %p163_p7 = scmp.lt.s32.totalorder %s1357_s21, 3 }
   0xa   : > { %p1435_p6 = por %p156_p3, %p42_p0  ;;  %s1359_s27 = smov [#allocation5]  }
   0xb   : > { %s1703_s24 = scalar_select %p1430_p4, 1, 0 }
   0xc   : > { %s1704_s25 = scalar_select %p1435_p6, 1, 0 }
   0xd   : > { %p1440_p8 = pnand %p963_p5, %p163_p7  ;;  %s175_s28 = sshll.u32 %s1359_s27, 4  ;;  %s176_s28 = int_to_ptr.vmem [resolvable:$true] %s175_s28 }
   0xe   : > { %s1360_s30 = smov [#allocation7]   ;;  %s1220_s7 = scalar_lea.vmem %s176_s28, 2048 }
   0xf   : > { %s1705_s26 = scalar_select %p1440_p8, 1, 0 }
  0x10   : > { %p1099_p9 = pneg %p1440_p8  ;;  %s191_s6 = sshll.u32 %s1360_s30, 4  ;;  %s192_s6 = int_to_ptr.vmem [resolvable:$true] %s191_s6 }
  0x11   : > { %p1221_p13 = scmp.ne.s32.totalorder %s176_s28, %s1220_s7  ;;  %p1228_p5 = scmp.lt.s32.totalorder %s176_s28, %s176_s28 }
  0x12   : > { %p1449_p11 = pnand %p1099_p9, %p1698_p1  ;;  %p1229_p7 = scmp.lt.s32.totalorder %s1220_s7, %s1220_s7 }
  0x14   : > { %p1211_p12 = pneg %p1449_p11  ;;  %p1230_p10 = por %p1229_p7, %p1228_p5 }
  0x16   : > { %p1223_p0 = pnand %p1221_p13, %p1211_p12 }
  0x18   : > { %p1224_p3 = pneg %p1223_p0 }
  0x1a   : > { %p1231_p9 = pnand %p1230_p10, %p1224_p3 }
  0x1c   : > { %1234 = shalt.err (!%p1231_p9)
}
  0x1d   : > { %s1361_s8 = smov 128   ;;  %s1362_s9 = smov 8  }
  0x1e   : > { %1102 = dma.hbm_to_vmem [thread:$0]  (!%p1449_p11), %s1693_s1, 2048, %s176_s28, [#allocation6], %s1361_s8, %s1361_s8, %s1362_s9  }
  0x1f   : > { %s1246_s12 = scalar_lea.vmem %s192_s6, 2048  ;;  %p1254_p2 = scmp.lt.s32.totalorder %s192_s6, %s192_s6 }
  0x20   : > { %p1247_p1 = scmp.ne.s32.totalorder %s192_s6, %s1246_s12  ;;  %p1255_p6 = scmp.lt.s32.totalorder %s1246_s12, %s1246_s12 }
  0x22   : > { %p1249_p13 = pnand %p1247_p1, %p1211_p12  ;;  %p1256_p5 = por %p1255_p6, %p1254_p2 }
  0x24   : > { %p1250_p0 = pneg %p1249_p13 }
  0x26   : > { %p1257_p10 = pnand %p1256_p5, %p1250_p0 }
  0x28   : > { %1260 = shalt.err (!%p1257_p10)
}
  0x29   : > { %s1699_s13 = smov 64   ;;  %s1364_s14 = smov 4  }
  0x2a   : > { %1105 = dma.hbm_to_vmem [thread:$0]  (!%p1449_p11), %s1695_s3, 2048, %s192_s6, [#allocation6], %s1699_s13, %s1699_s13, %s1364_s14  }
  0x2b   : > { %s1475_s17 = sadd.s32 1, %s1357_s21   ;;  %s29_s27 = sadd.s32 1, %s1353_s20 }
  0x2c   : > { %s26_s23 = ssub.s32 %s1357_s21, %s1475_s17  ;;  %p36_p2 = scmp.ne.s32.totalorder %s1353_s20, %s1349_s19 }
  0x2d   : > { %p27_p1 = scmp.eq.s32.totalorder %s26_s23, 0  ;;  %p37_p6 = scmp.eq.s32.totalorder %s1357_s21, 0 }
  0x2e   : > { %p1707_p3 = scmp.eq.s32.totalorder %s1421_s22, 1  ;;  %p1116_p9 = scmp.lt.s32.totalorder %s1357_s21, 2 }
  0x2f   : > { %s1484_s28 = scalar_select %p27_p1, %s1353_s20, %s29_s27  }
  0x30   : > { %p38_p12 = por %p37_p6, %p36_p2  ;;  %p1488_p7 = por %p1707_p3, %p36_p2 }
  0x31   : > { %s208_s30 = sand.u32 1, %s1353_s20   ;;  %s1021_s6 = sshll.u32 %s1357_s21, 10 }
  0x32   : > { %s1708_s29 = scalar_select %p1488_p7, 1, 0 }
  0x33   : > { %s967_s7 = sshll.u32 %s208_s30, 6  ;;  %s1498_s10 = scalar_lea.hbm %s1692_s0, %s1021_s6 }
  0x34   : > { %s212_s11 = scalar_lea.vmem [#allocation2], %s967_s7  ;;  %p1502_p11 = pnand %p1116_p9, %p38_p12 }
  0x35   : > { %s219_s12 = sshll.u32 %s212_s11, 4  ;;  %s1506_s16 = scalar_lea.sflag [#allocation3], %s208_s30  ;;  %s1500_s12 = int_to_ptr.vmem [resolvable:$true] %s219_s12 }
  0x36   : > { %s1261_s23 = scalar_lea.hbm %s1498_s10, 1024  ;;  %p1263_p0 = pneg %p1502_p11 }
  0x37   : > { %p1262_p13 = scmp.ne.s32.totalorder %s1498_s10, %s1261_s23  ;;  %s1266_s7 = scalar_lea.hbm %s1692_s0, 2048 }
  0x38   : > { %p1267_p1 = scmp.lt.s32.totalorder %s1498_s10, %s1692_s0  ;;  %p1268_p2 = scmp.lt.s32.totalorder %s1266_s7, %s1261_s23 }
  0x39   : > { %p1264_p5 = pnand %p1263_p0, %p1262_p13 }
  0x3a   : > { %p1269_p6 = por %p1268_p2, %p1267_p1 }
  0x3b   : > { %p1265_p10 = pneg %p1264_p5 }
  0x3d   : > { %p1270_p12 = pnand %p1269_p6, %p1265_p10 }
  0x3f   : > { %1273 = shalt.err (!%p1270_p12)
}
  0x40   : > { %s1274_s30 = scalar_lea.vmem %s1500_s12, 1024  ;;  %s1365_s11 = smov [#allocation2]  }
  0x41   : > { %p1275_p3 = scmp.ne.s32.totalorder %s1500_s12, %s1274_s30  ;;  %s1279_s13 = sshll.u32 %s1365_s11, 4  ;;  %s1280_s13 = int_to_ptr.vmem [resolvable:$false] %s1279_s13 }
  0x42   : > { %s1281_s27 = scalar_lea.vmem %s1280_s13, 2048  ;;  %p1282_p5 = scmp.lt.s32.totalorder %s1500_s12, %s1280_s13 }
  0x43   : > { %p1277_p9 = pnand %p1275_p3, %p1263_p0  ;;  %p1283_p7 = scmp.lt.s32.totalorder %s1281_s27, %s1274_s30 }
  0x45   : > { %p1278_p13 = pneg %p1277_p9  ;;  %p1284_p4 = por %p1283_p7, %p1282_p5 }
  0x47   : > { %p1285_p8 = pnand %p1284_p4, %p1278_p13 }
  0x49   : > { %1288 = shalt.err (!%p1285_p8)
}
  0x4a   : > { %s1710_s23 = smov 64   ;;  %p1711_p0 = scmp.ne.s32.totalorder %s1705_s26, 0 }
  0x4b   : > { %1109 = dma.hbm_to_vmem [thread:$0]  (!%p1502_p11), %s1498_s10, 1024, %s1500_s12, %s1506_s16, %s1710_s23, %s1710_s23, %s1364_s14  }
  0x4c   : > { %231 = sbr.rel (%p1711_p0) target bundleno = 597 (0x255), region = 40  ;;  %s1533_s6 = sand.u32 (!%p1711_p0), 1, %s1349_s19  }
  0x4d   : > { %s971_s13 = sshll.u32 (!%p1711_p0), %s1533_s6, 6  ;;  %s234_s7 = scalar_lea.sflag (!%p1711_p0), [#allocation3], %s1533_s6 }
  0x4e   : > { %s1537_s8 = scalar_lea.vmem (!%p1711_p0), [#allocation2], %s971_s13  ;;  %p1712_p4 = scmp.ne.s32.totalorder (!%p1711_p0), %s1703_s24, 0 }
  0x51   : > { %1332 = dma.done.wait (%p1712_p4), %s234_s7, 1024  }
  0x52   : > { %1334 = vsyncadd (%p1712_p4), %s234_s7, 4294966272  ;;  %p1713_p8 = scmp.eq.s32.totalorder %s1421_s22, 0 }
  0x54   : > { %1336 = dma.done.wait (%p1713_p8), [#allocation6], 4096   ;;  %p1714_p7 = pmov %p1713_p8 }
  0x55   : > { %v1366_v0 = vmov 0   ;;  %v1161_v1 = vld [vmem:[#allocation5 + $0x74] ss:$8 sps:$4 sm:$0xff]   ;;  %v1163_v2 = vld [vmem:[#allocation5 + $0x70] ss:$8 sps:$4 sm:$0xff]   ;;  %v1197_v19 = vld [vmem:[#allocation7 + $0x68] sm:$0xff]   ;;  %v309_v41 = vlaneseq }
  0x56   : > { %1338 = vsyncadd (%p1714_p7), [#allocation6], 4294963200  ;;  %479 = vmatprep.mubr.bf16.mxu0 %v1366_v0  ;;  %447 = vmatprep.subr.bf16.mxu0 %v1161_v1  ;;  %v1164_v3 = vld [vmem:[#allocation5 + $0x64] ss:$8 sps:$4 sm:$0xff]   ;;  %v1166_v4 = vld [vmem:[#allocation5 + $0x60] ss:$8 sps:$4 sm:$0xff]  }
  0x57   : > { %448 = vmatpush1.bf16.msra.mxu0 %v1163_v2  ;;  %v1167_v5 = vld [vmem:[#allocation5 + $0x54] ss:$8 sps:$4 sm:$0xff]   ;;  %v1169_v6 = vld [vmem:[#allocation5 + $0x50] ss:$8 sps:$4 sm:$0xff]   ;;  %v1170_v7 = vld [vmem:[#allocation5 + $0x44] ss:$8 sps:$4 sm:$0xff]  }
  0x58   : > { %449 = vmatprep.subr.bf16.mxu0 %v1164_v3  ;;  %v1172_v8 = vld [vmem:[#allocation5 + $0x40] ss:$8 sps:$4 sm:$0xff]   ;;  %v1173_v9 = vld [vmem:[#allocation5 + $0x34] ss:$8 sps:$4 sm:$0xff]   ;;  %v1175_v10 = vld [vmem:[#allocation5 + $0x30] ss:$8 sps:$4 sm:$0xff]  }
  0x59   : > { %v1176_v11 = vld [vmem:[#allocation5 + $0x24] ss:$8 sps:$4 sm:$0xff]   ;;  %v1178_v12 = vld [vmem:[#allocation5 + $0x20] ss:$8 sps:$4 sm:$0xff]   ;;  %v1179_v13 = vld [vmem:[#allocation5 + $0x14] ss:$8 sps:$4 sm:$0xff]  }
  0x5a   : > { %v1193_v14 = vld [vmem:[#allocation7 + $0x78] sm:$0xff]   ;;  %v1195_v17 = vld [vmem:[#allocation7 + $0x70] sm:$0xff]   ;;  %v1182_v20 = vld [vmem:[#allocation5 + $0x4] ss:$8 sps:$4 sm:$0xff]   ;;  %v310_v42 = vshrl.u32 %v309_v41, 7  ;;  %s974_s14 = sshll.u32 %s1533_s6, 7 }
  0x5b   : > { %450 = vmatpush1.bf16.msra.mxu0 %v1166_v4  ;;  %v1194_v15 = vld [vmem:[#allocation7 + $0x38] sm:$0xff]   ;;  %1023 = vmatprep.subr.bf16.mxu1 %v1193_v14  ;;  %v1196_v18 = vld [vmem:[#allocation7 + $0x30] sm:$0xff]   ;;  %v1184_v21 = vld [vmem:[#allocation5] ss:$8 sps:$4 sm:$0xff]   ;;  %s1609_s15 = scalar_lea.vmem [#allocation8], %s974_s14  ;;  %s1022_s16 = sshll.u32 %s1421_s22, 11 }
  0x5c   : > { %451 = vmatprep.subr.bf16.mxu0 %v1167_v5  ;;  %v1181_v16 = vld [vmem:[#allocation5 + $0x10] ss:$8 sps:$4 sm:$0xff]   ;;  %1024 = vmatpush3.bf16.msra.mxu1 %v1194_v15  ;;  %v1198_v22 = vld [vmem:[#allocation7 + $0x28] sm:$0xff]   ;;  %v1199_v23 = vld [vmem:[#allocation7 + $0x60] sm:$0xff]   ;;  %v315_v43 = vsub.s32 1, %v310_v42  ;;  %v311_v44 = vsub.s32 0, %v310_v42  ;;  %s1645_s27 = scalar_lea.hbm %s1697_s5, %s1022_s16 }
  0x5d   : > { %1025 = vmatprep.subr.bf16.mxu1 %v1195_v17  ;;  %v1185_v24 = vld [vmem:[%s1537_s8] sm:$0xff]   ;;  %v1201_v26 = vld [vmem:[#allocation7 + $0x58] sm:$0xff]   ;;  %v1186_v28 = vld [vmem:[%s1537_s8 + $0x8] sm:$0xff]   ;;  %s870_s9 = sshll.u32 %s1609_s15, 4  ;;  %s857_s23 = scalar_lea.sflag [#allocation4], %s1533_s6  ;;  %s1647_s9 = int_to_ptr.vmem [resolvable:$true] %s870_s9 }
  0x5e   : > { %v1200_v25 = vld [vmem:[#allocation7 + $0x20] sm:$0xff]   ;;  %v1202_v27 = vld [vmem:[#allocation7 + $0x18] sm:$0xff]   ;;  %v1187_v29 = vld [vmem:[%s1537_s8 + $0x10] sm:$0xff]   ;;  %s1289_s13 = scalar_lea.vmem %s1647_s9, 2048  ;;  %p1715_p10 = scmp.ne.s32.totalorder %s1708_s29, 0 }
  0x5f   : > { %452 = vmatpush1.bf16.msra.mxu0 %v1169_v6  ;;  %v1188_v30 = vld [vmem:[%s1537_s8 + $0x18] sm:$0xff]   ;;  %v1189_v31 = vld [vmem:[%s1537_s8 + $0x20] sm:$0xff]   ;;  %v1190_v32 = vld [vmem:[%s1537_s8 + $0x28] sm:$0xff]   ;;  %p1290_p11 = scmp.ne.s32.totalorder %s1647_s9, %s1289_s13  ;;  %s1367_s22 = smov [#allocation8]  }
  0x60   : > { %453 = vmatprep.subr.bf16.mxu0 %v1170_v7  ;;  %1026 = vmatpush3.bf16.msra.mxu1 %v1196_v18  ;;  %v1191_v33 = vld [vmem:[%s1537_s8 + $0x30] sm:$0xff]   ;;  %v1192_v34 = vld [vmem:[%s1537_s8 + $0x38] sm:$0xff]   ;;  %v1205_v37 = vld [vmem:[#allocation7 + $0x48] sm:$0xff]   ;;  %s1293_s7 = sshll.u32 %s1367_s22, 4  ;;  %s1294_s7 = int_to_ptr.vmem [resolvable:$false] %s1293_s7 }
  0x61   : > { %1027 = vmatprep.subr.bf16.mxu1 %v1197_v19  ;;  %v1203_v35 = vld [vmem:[#allocation7 + $0x50] sm:$0xff]   ;;  %v1206_v38 = vld [vmem:[#allocation7 + $0x8] sm:$0xff]   ;;  %v1207_v39 = vld [vmem:[#allocation7 + $0x40] sm:$0xff]   ;;  %p1291_p1 = pnand %p1290_p11, %p1715_p10  ;;  %s1295_s8 = scalar_lea.vmem %s1294_s7, 4096 }
  0x62   : > { %v1204_v36 = vld [vmem:[#allocation7 + $0x10] sm:$0xff]   ;;  %v1208_v40 = vld [vmem:[#allocation7] sm:$0xff]   ;;  %p1296_p6 = scmp.lt.s32.totalorder %s1647_s9, %s1294_s7  ;;  %p1297_p12 = scmp.lt.s32.totalorder %s1295_s8, %s1289_s13 }
  0x63   : > { %454 = vmatpush1.bf16.msra.mxu0 %v1172_v8  ;;  %v307_v45 = vld [vmem:[%s1694_s2] sm:$0x3]  ;;  %p1292_p2 = pneg %p1291_p1 }
  0x64   : > { %455 = vmatprep.subr.bf16.mxu0 %v1173_v9  ;;  %1028 = vmatpush3.bf16.msra.mxu1 %v1198_v22  ;;  %v1566_v47 = vrot.slane %v307_v45, %v315_v43  ;;  %v1568_v48 = vrot.slane %v307_v45, %v311_v44  ;;  %p1298_p3 = por %p1297_p12, %p1296_p6 }
  0x65   : > { %1029 = vmatprep.subr.bf16.mxu1 %v1199_v23 }
  0x66   : > { %p1299_p9 = pnand %p1298_p3, %p1292_p2 }
  0x67   : > { %456 = vmatpush1.bf16.msra.mxu0 %v1175_v10 }
  0x68   : > { %457 = vmatprep.subr.bf16.mxu0 %v1176_v11  ;;  %1030 = vmatpush3.bf16.msra.mxu1 %v1200_v25 }
  0x69   : > { %1031 = vmatprep.subr.bf16.mxu1 %v1201_v26 }
  0x6b   : > { %458 = vmatpush1.bf16.msra.mxu0 %v1178_v12 }
  0x6c   : > { %459 = vmatprep.subr.bf16.mxu0 %v1179_v13  ;;  %1032 = vmatpush3.bf16.msra.mxu1 %v1202_v27 }
  0x6d   : > { %1033 = vmatprep.subr.bf16.mxu1 %v1203_v35 }
  0x6f   : > { %460 = vmatpush1.bf16.msra.mxu0 %v1181_v16 }
  0x70   : > { %461 = vmatprep.subr.bf16.mxu0 %v1182_v20  ;;  %1034 = vmatpush3.bf16.msra.mxu1 %v1204_v36 }
  0x71   : > { %1035 = vmatprep.subr.bf16.mxu1 %v1205_v37 }
  0x73   : > { %462 = vmatpush1.bf16.msra.mxu0 %v1184_v21 }
  0x74   : > { %1036 = vmatpush3.bf16.msra.mxu1 %v1206_v38 }
  0x75   : > { %1037 = vmatprep.subr.bf16.mxu1 %v1207_v39 }
  0x76   : > { %480 = vmatmul.mubr.bf16.vlgmr.msra.gmra.mxu0 %v1185_v24 }
  0x77   : > { %489 = vmatprep.mubr.bf16.mxu0 %v1366_v0 }
  0x78   : > { %1038 = vmatpush3.bf16.msra.mxu1 %v1208_v40 }
  0x7e   : > { %490 = vmatmul.mubr.bf16.gmra.mxu0 %v1186_v28 }
  0x7f   : > { %499 = vmatprep.mubr.bf16.mxu0 %v1366_v0 }
  0x86   : > { %500 = vmatmul.mubr.bf16.gmra.mxu0 %v1187_v29 }
  0x87   : > { %509 = vmatprep.mubr.bf16.mxu0 %v1366_v0 }
  0x8e   : > { %510 = vmatmul.mubr.bf16.gmra.mxu0 %v1188_v30 }
  0x8f   : > { %519 = vmatprep.mubr.bf16.mxu0 %v1366_v0 }
  0x96   : > { %520 = vmatmul.mubr.bf16.gmra.mxu0 %v1189_v31 }
  0x97   : > { %529 = vmatprep.mubr.bf16.mxu0 %v1366_v0 }
  0x9e   : > { %530 = vmatmul.mubr.bf16.gmra.mxu0 %v1190_v32 }
  0x9f   : > { %539 = vmatprep.mubr.bf16.mxu0 %v1366_v0 }
  0xa6   : > { %540 = vmatmul.mubr.bf16.gmra.mxu0 %v1191_v33 }
  0xa7   : > { %549 = vmatprep.mubr.bf16.mxu0 %v1366_v0 }
  0xae   : > { %550 = vmatmul.mubr.bf16.gmra.mxu0 %v1192_v34 }
 0x136   : > { %v481_v46 = vpop.f32.mrf.mxu0 }
 0x137   : > { %v482_v53 = vadd.f32 %v481_v46, %v1568_v48 }
 0x138   : > { %v483_v49 = vpop.f32.mrf.mxu0 }
 0x139   : > { %v484_v51 = vadd.f32 %v483_v49, %v1566_v47  ;;  %v560_v60 = vmax.f32 %v482_v53, 0.0 }
 0x13a   : > { %v485_v50 = vpop.f32.mrf.mxu0 }
 0x13b   : > { %v486_v52 = vadd.f32 %v485_v50, %v1568_v48  ;;  %v561_v58 = vmax.f32 %v484_v51, 0.0 }
 0x13c   : > { %v487_v54 = vpop.f32.mrf.mxu0 }
 0x13d   : > { %v488_v55 = vadd.f32 %v487_v54, %v1566_v47  ;;  %v562_v56 = vmax.f32 %v486_v52, 0.0 }
 0x13e   : > { %v491_v57 = vpop.f32.mrf.mxu0 }
 0x13f   : > { %v563_v59 = vmax.f32 %v488_v55, 0.0  ;;  %v592_v63 = vpack.c.bf16 %v562_v56, %v560_v60  ;;  %v492_v3 = vadd.f32 %v491_v57, %v1568_v48 }
 0x140   : > { %v493_v61 = vpop.f32.mrf.mxu0 }
 0x141   : > { %v593_v62 = vpack.c.bf16 %v563_v59, %v561_v58  ;;  %v494_v1 = vadd.f32 %v493_v61, %v1566_v47  ;;  %v564_v10 = vmax.f32 %v492_v3, 0.0 }
 0x142   : > { %v495_v0 = vpop.f32.mrf.mxu0 }
 0x143   : > { %v496_v2 = vadd.f32 %v495_v0, %v1568_v48  ;;  %775 = vmatprep.mubr.bf16.mxu1 %v593_v62  ;;  %v565_v8 = vmax.f32 %v494_v1, 0.0 }
 0x144   : > { %v497_v4 = vpop.f32.mrf.mxu0  ;;  %776 = vmatmul.mubr.bf16.vlgmr.msra.gmra.mxu1 %v592_v63 }
 0x145   : > { %v498_v5 = vadd.f32 %v497_v4, %v1566_v47  ;;  %v566_v6 = vmax.f32 %v496_v2, 0.0 }
 0x146   : > { %v501_v7 = vpop.f32.mrf.mxu0 }
 0x147   : > { %v567_v9 = vmax.f32 %v498_v5, 0.0  ;;  %v594_v13 = vpack.c.bf16 %v566_v6, %v564_v10  ;;  %v502_v17 = vadd.f32 %v501_v7, %v1568_v48 }
 0x148   : > { %v503_v11 = vpop.f32.mrf.mxu0 }
 0x149   : > { %v595_v12 = vpack.c.bf16 %v567_v9, %v565_v8  ;;  %v504_v15 = vadd.f32 %v503_v11, %v1566_v47  ;;  %v568_v24 = vmax.f32 %v502_v17, 0.0 }
 0x14a   : > { %v505_v14 = vpop.f32.mrf.mxu0 }
 0x14b   : > { %v506_v16 = vadd.f32 %v505_v14, %v1568_v48  ;;  %783 = vmatprep.mubr.bf16.mxu1 %v595_v12  ;;  %v569_v22 = vmax.f32 %v504_v15, 0.0 }
 0x14c   : > { %v507_v18 = vpop.f32.mrf.mxu0  ;;  %784 = vmatmul.mubr.bf16.gmra.mxu1 %v594_v13 }
 0x14d   : > { %v508_v19 = vadd.f32 %v507_v18, %v1566_v47  ;;  %v570_v20 = vmax.f32 %v506_v16, 0.0 }
 0x14e   : > { %v511_v21 = vpop.f32.mrf.mxu0 }
 0x14f   : > { %v571_v23 = vmax.f32 %v508_v19, 0.0  ;;  %v596_v27 = vpack.c.bf16 %v570_v20, %v568_v24  ;;  %v512_v31 = vadd.f32 %v511_v21, %v1568_v48 }
 0x150   : > { %v513_v25 = vpop.f32.mrf.mxu0 }
 0x151   : > { %v597_v26 = vpack.c.bf16 %v571_v23, %v569_v22  ;;  %v514_v29 = vadd.f32 %v513_v25, %v1566_v47  ;;  %v572_v38 = vmax.f32 %v512_v31, 0.0 }
 0x152   : > { %v515_v28 = vpop.f32.mrf.mxu0 }
 0x153   : > { %v516_v30 = vadd.f32 %v515_v28, %v1568_v48  ;;  %791 = vmatprep.mubr.bf16.mxu1 %v597_v26  ;;  %v573_v36 = vmax.f32 %v514_v29, 0.0 }
 0x154   : > { %v517_v32 = vpop.f32.mrf.mxu0  ;;  %792 = vmatmul.mubr.bf16.gmra.mxu1 %v596_v27 }
 0x155   : > { %v518_v33 = vadd.f32 %v517_v32, %v1566_v47  ;;  %v574_v34 = vmax.f32 %v516_v30, 0.0 }
 0x156   : > { %v521_v35 = vpop.f32.mrf.mxu0 }
 0x157   : > { %v575_v37 = vmax.f32 %v518_v33, 0.0  ;;  %v598_v41 = vpack.c.bf16 %v574_v34, %v572_v38  ;;  %v522_v45 = vadd.f32 %v521_v35, %v1568_v48  ;;  %v1606_v35 = vld [vmem:[%s1696_s4] ss:$0 sm:$0xff] }
 0x158   : > { %v523_v39 = vpop.f32.mrf.mxu0 }
 0x159   : > { %v599_v40 = vpack.c.bf16 %v575_v37, %v573_v36  ;;  %v524_v43 = vadd.f32 %v523_v39, %v1566_v47  ;;  %v576_v54 = vmax.f32 %v522_v45, 0.0 }
 0x15a   : > { %v525_v42 = vpop.f32.mrf.mxu0 }
 0x15b   : > { %v526_v44 = vadd.f32 %v525_v42, %v1568_v48  ;;  %799 = vmatprep.mubr.bf16.mxu1 %v599_v40  ;;  %v577_v52 = vmax.f32 %v524_v43, 0.0 }
 0x15c   : > { %v527_v46 = vpop.f32.mrf.mxu0  ;;  %800 = vmatmul.mubr.bf16.gmra.mxu1 %v598_v41 }
 0x15d   : > { %v528_v49 = vadd.f32 %v527_v46, %v1566_v47  ;;  %v578_v50 = vmax.f32 %v526_v44, 0.0 }
 0x15e   : > { %v531_v51 = vpop.f32.mrf.mxu0 }
 0x15f   : > { %v579_v53 = vmax.f32 %v528_v49, 0.0  ;;  %v600_v57 = vpack.c.bf16 %v578_v50, %v576_v54  ;;  %v532_v61 = vadd.f32 %v531_v51, %v1568_v48 }
 0x160   : > { %v533_v55 = vpop.f32.mrf.mxu0 }
 0x161   : > { %v601_v56 = vpack.c.bf16 %v579_v53, %v577_v52  ;;  %v534_v59 = vadd.f32 %v533_v55, %v1566_v47  ;;  %v580_v4 = vmax.f32 %v532_v61, 0.0 }
 0x162   : > { %v535_v58 = vpop.f32.mrf.mxu0 }
 0x163   : > { %v536_v60 = vadd.f32 %v535_v58, %v1568_v48  ;;  %807 = vmatprep.mubr.bf16.mxu1 %v601_v56  ;;  %v581_v2 = vmax.f32 %v534_v59, 0.0 }
 0x164   : > { %v537_v62 = vpop.f32.mrf.mxu0  ;;  %808 = vmatmul.mubr.bf16.gmra.mxu1 %v600_v57 }
 0x165   : > { %v538_v63 = vadd.f32 %v537_v62, %v1566_v47  ;;  %v582_v0 = vmax.f32 %v536_v60, 0.0 }
 0x166   : > { %v541_v1 = vpop.f32.mrf.mxu0 }
 0x167   : > { %v583_v3 = vmax.f32 %v538_v63, 0.0  ;;  %v602_v7 = vpack.c.bf16 %v582_v0, %v580_v4  ;;  %v542_v11 = vadd.f32 %v541_v1, %v1568_v48 }
 0x168   : > { %v543_v5 = vpop.f32.mrf.mxu0 }
 0x169   : > { %v603_v6 = vpack.c.bf16 %v583_v3, %v581_v2  ;;  %v544_v9 = vadd.f32 %v543_v5, %v1566_v47  ;;  %v584_v18 = vmax.f32 %v542_v11, 0.0 }
 0x16a   : > { %v545_v8 = vpop.f32.mrf.mxu0 }
 0x16b   : > { %v546_v10 = vadd.f32 %v545_v8, %v1568_v48  ;;  %815 = vmatprep.mubr.bf16.mxu1 %v603_v6  ;;  %v585_v16 = vmax.f32 %v544_v9, 0.0 }
 0x16c   : > { %v547_v12 = vpop.f32.mrf.mxu0  ;;  %816 = vmatmul.mubr.bf16.gmra.mxu1 %v602_v7 }
 0x16d   : > { %v548_v13 = vadd.f32 %v547_v12, %v1566_v47  ;;  %v586_v14 = vmax.f32 %v546_v10, 0.0 }
 0x16e   : > { %v551_v15 = vpop.f32.mrf.mxu0 }
 0x16f   : > { %v587_v17 = vmax.f32 %v548_v13, 0.0  ;;  %v604_v21 = vpack.c.bf16 %v586_v14, %v584_v18  ;;  %v552_v25 = vadd.f32 %v551_v15, %v1568_v48 }
 0x170   : > { %v553_v19 = vpop.f32.mrf.mxu0 }
 0x171   : > { %v605_v20 = vpack.c.bf16 %v587_v17, %v585_v16  ;;  %v554_v23 = vadd.f32 %v553_v19, %v1566_v47  ;;  %v588_v31 = vmax.f32 %v552_v25, 0.0 }
 0x172   : > { %v555_v22 = vpop.f32.mrf.mxu0 }
 0x173   : > { %v556_v24 = vadd.f32 %v555_v22, %v1568_v48  ;;  %823 = vmatprep.mubr.bf16.mxu1 %v605_v20  ;;  %v589_v29 = vmax.f32 %v554_v23, 0.0 }
 0x174   : > { %v557_v26 = vpop.f32.mrf.mxu0  ;;  %824 = vmatmul.mubr.bf16.gmra.mxu1 %v604_v21 }
 0x175   : > { %v558_v27 = vadd.f32 %v557_v26, %v1566_v47  ;;  %v590_v28 = vmax.f32 %v556_v24, 0.0 }
 0x177   : > { %v591_v30 = vmax.f32 %v558_v27, 0.0  ;;  %v606_v33 = vpack.c.bf16 %v590_v28, %v588_v31 }
 0x179   : > { %v607_v32 = vpack.c.bf16 %v591_v30, %v589_v29 }
 0x17b   : > { %831 = vmatprep.mubr.bf16.mxu1 %v607_v32 }
 0x17c   : > { %832 = vmatmul.mubr.bf16.gmra.mxu1 %v606_v33 }
 0x204   : > { %v1039_v34 = vpop.f32.mrf.mxu1 }
 0x206   : > { %v1040_v48 = vpop.f32.mrf.mxu1 }
 0x207   : > { %v1041_v36 = vadd.f32 %v1040_v48, %v1039_v34 }
 0x208   : > { %v1042_v37 = vpop.f32.mrf.mxu1 }
 0x209   : > { %v778_v47 = vadd.f32 %v1041_v36, %v1606_v35 }
 0x20a   : > { %v1043_v38 = vpop.f32.mrf.mxu1 }
 0x20b   : > { %840 = vst [vmem:[%s1609_s15] sm:$0xff] %v778_v47  ;;  %v1044_v39 = vadd.f32 %v1043_v38, %v1042_v37 }
 0x20c   : > { %v1045_v40 = vpop.f32.mrf.mxu1 }
 0x20d   : > { %v781_v41 = vadd.f32 %v1044_v39, %v1606_v35 }
 0x20e   : > { %v1046_v42 = vpop.f32.mrf.mxu1 }
 0x20f   : > { %841 = vst [vmem:[%s1609_s15 + $0x8] sm:$0xff] %v781_v41  ;;  %v1047_v43 = vadd.f32 %v1046_v42, %v1045_v40 }
 0x210   : > { %v1048_v44 = vpop.f32.mrf.mxu1 }
 0x211   : > { %v786_v45 = vadd.f32 %v1047_v43, %v1606_v35 }
 0x212   : > { %v1049_v46 = vpop.f32.mrf.mxu1 }
 0x213   : > { %842 = vst [vmem:[%s1609_s15 + $0x10] sm:$0xff] %v786_v45  ;;  %v1050_v49 = vadd.f32 %v1049_v46, %v1048_v44 }
 0x214   : > { %v1051_v50 = vpop.f32.mrf.mxu1 }
 0x215   : > { %v789_v51 = vadd.f32 %v1050_v49, %v1606_v35 }
 0x216   : > { %v1052_v52 = vpop.f32.mrf.mxu1 }
 0x217   : > { %843 = vst [vmem:[%s1609_s15 + $0x18] sm:$0xff] %v789_v51  ;;  %v1053_v53 = vadd.f32 %v1052_v52, %v1051_v50 }
 0x218   : > { %v1054_v54 = vpop.f32.mrf.mxu1 }
 0x219   : > { %v794_v55 = vadd.f32 %v1053_v53, %v1606_v35 }
 0x21a   : > { %v1055_v56 = vpop.f32.mrf.mxu1 }
 0x21b   : > { %844 = vst [vmem:[%s1609_s15 + $0x20] sm:$0xff] %v794_v55  ;;  %v1056_v57 = vadd.f32 %v1055_v56, %v1054_v54 }
 0x21c   : > { %v1057_v58 = vpop.f32.mrf.mxu1 }
 0x21d   : > { %v797_v59 = vadd.f32 %v1056_v57, %v1606_v35 }
 0x21e   : > { %v1058_v60 = vpop.f32.mrf.mxu1 }
 0x21f   : > { %845 = vst [vmem:[%s1609_s15 + $0x28] sm:$0xff] %v797_v59  ;;  %v1059_v61 = vadd.f32 %v1058_v60, %v1057_v58 }
 0x220   : > { %v1060_v62 = vpop.f32.mrf.mxu1 }
 0x221   : > { %v802_v63 = vadd.f32 %v1059_v61, %v1606_v35 }
 0x222   : > { %v1061_v0 = vpop.f32.mrf.mxu1 }
 0x223   : > { %846 = vst [vmem:[%s1609_s15 + $0x30] sm:$0xff] %v802_v63  ;;  %v1062_v1 = vadd.f32 %v1061_v0, %v1060_v62 }
 0x224   : > { %v1063_v2 = vpop.f32.mrf.mxu1 }
 0x225   : > { %v805_v3 = vadd.f32 %v1062_v1, %v1606_v35 }
 0x226   : > { %v1064_v4 = vpop.f32.mrf.mxu1 }
 0x227   : > { %847 = vst [vmem:[%s1609_s15 + $0x38] sm:$0xff] %v805_v3  ;;  %v1065_v5 = vadd.f32 %v1064_v4, %v1063_v2 }
 0x228   : > { %v1066_v6 = vpop.f32.mrf.mxu1 }
 0x229   : > { %v810_v7 = vadd.f32 %v1065_v5, %v1606_v35 }
 0x22a   : > { %v1067_v8 = vpop.f32.mrf.mxu1 }
 0x22b   : > { %848 = vst [vmem:[%s1609_s15 + $0x40] sm:$0xff] %v810_v7  ;;  %v1068_v9 = vadd.f32 %v1067_v8, %v1066_v6 }
 0x22c   : > { %v1069_v10 = vpop.f32.mrf.mxu1 }
 0x22d   : > { %v813_v11 = vadd.f32 %v1068_v9, %v1606_v35 }
 0x22e   : > { %v1070_v12 = vpop.f32.mrf.mxu1 }
 0x22f   : > { %849 = vst [vmem:[%s1609_s15 + $0x48] sm:$0xff] %v813_v11  ;;  %v1071_v13 = vadd.f32 %v1070_v12, %v1069_v10 }
 0x230   : > { %v1072_v14 = vpop.f32.mrf.mxu1 }
 0x231   : > { %v818_v15 = vadd.f32 %v1071_v13, %v1606_v35 }
 0x232   : > { %v1073_v16 = vpop.f32.mrf.mxu1 }
 0x233   : > { %850 = vst [vmem:[%s1609_s15 + $0x50] sm:$0xff] %v818_v15  ;;  %v1074_v17 = vadd.f32 %v1073_v16, %v1072_v14 }
 0x234   : > { %v1075_v18 = vpop.f32.mrf.mxu1 }
 0x235   : > { %v821_v19 = vadd.f32 %v1074_v17, %v1606_v35 }
 0x236   : > { %v1076_v20 = vpop.f32.mrf.mxu1 }
 0x237   : > { %851 = vst [vmem:[%s1609_s15 + $0x58] sm:$0xff] %v821_v19  ;;  %v1077_v21 = vadd.f32 %v1076_v20, %v1075_v18 }
 0x238   : > { %v1078_v22 = vpop.f32.mrf.mxu1 }
 0x239   : > { %v826_v23 = vadd.f32 %v1077_v21, %v1606_v35 }
 0x23a   : > { %v1079_v24 = vpop.f32.mrf.mxu1 }
 0x23b   : > { %852 = vst [vmem:[%s1609_s15 + $0x60] sm:$0xff] %v826_v23  ;;  %v1080_v25 = vadd.f32 %v1079_v24, %v1078_v22 }
 0x23c   : > { %v1081_v26 = vpop.f32.mrf.mxu1 }
 0x23d   : > { %v829_v27 = vadd.f32 %v1080_v25, %v1606_v35 }
 0x23e   : > { %v1082_v28 = vpop.f32.mrf.mxu1 }
 0x23f   : > { %853 = vst [vmem:[%s1609_s15 + $0x68] sm:$0xff] %v829_v27  ;;  %v1083_v29 = vadd.f32 %v1082_v28, %v1081_v26 }
 0x240   : > { %v1084_v30 = vpop.f32.mrf.mxu1 }
 0x241   : > { %v834_v31 = vadd.f32 %v1083_v29, %v1606_v35 }
 0x242   : > { %v1085_v32 = vpop.f32.mrf.mxu1 }
 0x243   : > { %854 = vst [vmem:[%s1609_s15 + $0x70] sm:$0xff] %v834_v31  ;;  %v1086_v33 = vadd.f32 %v1085_v32, %v1084_v30 }
 0x245   : > { %v837_v34 = vadd.f32 %v1086_v33, %v1606_v35 }
 0x247   : > { %855 = vst [vmem:[%s1609_s15 + $0x78] sm:$0xff] %v837_v34 }
 0x248   : > { %1302 = shalt.err (!%p1299_p9)
}
 0x249   : > { %s1303_s24 = scalar_lea.hbm %s1645_s27, 2048  ;;  %s1307_s10 = scalar_lea.hbm %s1697_s5, 4096 }
 0x24a   : > { %p1304_p13 = scmp.ne.s32.totalorder %s1645_s27, %s1303_s24  ;;  %p1308_p4 = scmp.lt.s32.totalorder %s1645_s27, %s1697_s5 }
 0x24b   : > { %p1309_p8 = scmp.lt.s32.totalorder %s1307_s10, %s1303_s24 }
 0x24c   : > { %p1305_p5 = pnand %p1304_p13, %p1715_p10 }
 0x24d   : > { %p1310_p7 = por %p1309_p8, %p1308_p4 }
 0x24e   : > { %p1306_p0 = pneg %p1305_p5 }
 0x250   : > { %p1311_p11 = pnand %p1310_p7, %p1306_p0 }
 0x252   : > { %1314 = shalt.err (!%p1311_p11)
}
 0x253   : > { %s1368_s16 = smov 128   ;;  %s1369_s30 = smov 8  }
 0x254   : > { %1097 = dma.vmem_to_hbm [thread:$0]  (%p1715_p10), %s1647_s9, 2048, %s1645_s27, %s857_s23, %s1368_s16, %s1368_s16, %s1369_s30  }
 0x255 PF: > { %s885_s11 = sand.u32 1, %s1345_s18   ;;  %p1716_p1 = scmp.ne.s32.totalorder %s1704_s25, 0 }
 0x256   : > { %p1717_p2 = scmp.ge.s32.totalorder %s1357_s21, 2  ;;  %s886_s13 = scalar_lea.sflag [#allocation4], %s885_s11 }
 0x258   : > { %p1111_p6 = pnand %p1717_p2, %p1716_p1 }
 0x25a   : > { %p1112_p12 = pneg %p1111_p6 }
 0x25c   : > { %1340 = dma.done.wait (%p1112_p12), %s886_s13, 2048  }
 0x25d   : > { %1342 = vsyncadd (%p1112_p12), %s886_s13, 4294965248  ;;  %p19_p3 = scmp.ge.s32.totalorder %s1475_s17, 4   ;;  %s1718_s18 = smov %s1349_s19 }
 0x25e   : > { %s1719_s19 = smov %s1353_s20  ;;  %s1720_s20 = smov %s1484_s28 }
 0x25f   : > { %s1721_s21 = smov %s1475_s17  ;;  %21 = sbr.rel (!%p19_p3) target bundleno = 6 (0x6), region = 93 }
 0x264   :  { %891 = vsyncpa [#allocation3], 1 }
 0x265   :  { %893 = vsyncpa [#allocation3 + $0x1], 1 }
 0x266   :  { %894 = vsyncpa [#allocation6], 1 }
 0x267   :  { %895 = vsyncpa [#allocation4], 1 }
 0x268   :  { %897 = vsyncpa [#allocation4 + $0x1], 1 }

</bundles_post_ra>
